<compile_context>
chip_gen: v7x
topology: tpu7x:2x2x1
jax: 0.10.0
libtpu: 0.0.40
codegen_flags: <defaults>
</compile_context>

<pallas_src>
import jax
import jax.numpy as jnp
from jax.experimental import pallas as pl
from jax.experimental.pallas import tpu as pltpu


LANES = 128          # vreg lane width (last dim)
SUBLANES = 8         # vreg sublane count (second-to-last dim)
_TILE_BYTES = 1 << 20   # ~1 MiB per pipelined tile (~85% of HBM roofline)
_FUSE_BYTES = 2 << 20   # fuse tensors into one call when each slab <= 2 MiB
_VMEM_LIMIT = 24 * 1024 * 1024  # conservative; fits v5e/v6e/v7x scoped VMEM


# ----------------------------------------------------------------------------
# Pallas identity kernels (the torch.nn.Identity hot path)
# ----------------------------------------------------------------------------
def _identity_kernel(x_ref, o_ref):
    o_ref[...] = x_ref[...]


def _make_fused_identity_kernel(k):
    def kernel(*refs):            # refs = (in_0..in_{k-1}, out_0..out_{k-1})
        for i in range(k):
            refs[k + i][...] = refs[i][...]
    return kernel


# ----------------------------------------------------------------------------
# Slab helpers (glue): flatten to lane-dense (rows, 128), pad only if needed.
# ----------------------------------------------------------------------------
def _to_slab(x):
    n = x.size
    flat = x.reshape(-1)
    if n % LANES != 0:
        pad_to = SUBLANES * LANES
        padded = ((n + pad_to - 1) // pad_to) * pad_to
        flat = jnp.pad(flat, (0, padded - n))
    rows = flat.shape[0] // LANES
    return flat.reshape(rows, LANES), n


def _from_slab(slab, n, shape):
    if slab.shape[0] * LANES == n:
        return slab.reshape(shape)
    return slab.reshape(-1)[:n].reshape(shape)


# ----------------------------------------------------------------------------
# Single-tensor identity: tiled, pipelined, aliased copy.
# ----------------------------------------------------------------------------
def _identity_one(slab):
    rows = slab.shape[0]
    itemsize = jnp.dtype(slab.dtype).itemsize
    nbytes = rows * LANES * itemsize

    tile_rows = max(SUBLANES,
                    (_TILE_BYTES // (LANES * itemsize)) // SUBLANES * SUBLANES)
    if rows <= tile_rows:
        tr, grid = rows, (1,)          # full-extent block (always legal)
    else:
        tr, grid = tile_rows, (pl.cdiv(rows, tile_rows),)

    return pl.pallas_call(
        _identity_kernel,
        out_shape=jax.ShapeDtypeStruct((rows, LANES), slab.dtype),
        grid=grid,
        in_specs=[pl.BlockSpec((tr, LANES), lambda i: (i, 0))],
        out_specs=pl.BlockSpec((tr, LANES), lambda i: (i, 0)),
        input_output_aliases={0: 0},
        compiler_params=pltpu.CompilerParams(
            dimension_semantics=("parallel",),
            vmem_limit_bytes=_VMEM_LIMIT,
        ),
        cost_estimate=pl.CostEstimate(
            flops=0, transcendentals=0, bytes_accessed=2 * nbytes),
    )(slab)


# ----------------------------------------------------------------------------
# Fused identity for small tensors: one pallas_call, k inputs / k outputs.
# ----------------------------------------------------------------------------
def _identity_fused(slabs):
    k = len(slabs)
    total_bytes = sum(s.shape[0] * LANES * jnp.dtype(s.dtype).itemsize
                      for s in slabs)
    return pl.pallas_call(
        _make_fused_identity_kernel(k),
        out_shape=tuple(jax.ShapeDtypeStruct(s.shape, s.dtype) for s in slabs),
        grid=(1,),
        in_specs=[pl.BlockSpec(s.shape, lambda i: (0, 0)) for s in slabs],
        out_specs=tuple(pl.BlockSpec(s.shape, lambda i: (0, 0)) for s in slabs),
        input_output_aliases={i: i for i in range(k)},
        compiler_params=pltpu.CompilerParams(
            dimension_semantics=("arbitrary",),
            vmem_limit_bytes=_VMEM_LIMIT,
        ),
        cost_estimate=pl.CostEstimate(
            flops=0, transcendentals=0, bytes_accessed=2 * total_bytes),
    )(*slabs)


def pallas_identity_multi(*tensors):
    """torch.nn.Identity over several tensors, as Pallas TPU copy kernel(s)."""
    slabs, counts = [], []
    for t in tensors:
        s, n = _to_slab(t)
        slabs.append(s)
        counts.append(n)

    small = all(s.shape[0] * LANES * jnp.dtype(s.dtype).itemsize <= _FUSE_BYTES
                for s in slabs)
    if small and len(slabs) > 1:
        outs = _identity_fused(slabs)           # one launch for all tensors
    else:
        outs = tuple(_identity_one(s) for s in slabs)

    return tuple(_from_slab(o, n, t.shape)
                 for o, n, t in zip(outs, counts, tensors))


# ----------------------------------------------------------------------------
# Synthetic deterministic child (NOT part of RecordDouble; plain-JAX glue).
# It produces the (text_output, image_output) tuple the wrapped child would.
# ----------------------------------------------------------------------------
def make_child_params(hidden: int):
    key = jax.random.PRNGKey(42)
    w = jax.random.normal(key, (hidden, hidden), dtype=jnp.float32) * 0.02
    return {"w_text": w}


def synthetic_child(params, x_text, x_image):
    # text branch: (B, S, H) @ (H, H)
    text_output = jnp.einsum("bsh,hk->bsk", x_text, params["w_text"])
    # image branch: elementwise transform, NCHW preserved
    image_output = 2.0 * x_image + 1.0
    return text_output, image_output


# ----------------------------------------------------------------------------
# RecordDouble forward
# ----------------------------------------------------------------------------
def record_double_forward(child_fn, child_params, *args, **kwargs):
    text_output, image_output = child_fn(child_params, *args, **kwargs)
    # self.text_output = Identity(); self.image_output = Identity()
    return pallas_identity_multi(text_output, image_output)


if __name__ == "__main__":
    # Small shapes: text (batch=2, seq=8, hidden=32); image NCHW (2, 4, 16, 16)
    key = jax.random.PRNGKey(0)
    k1, k2 = jax.random.split(key)
    x_text = jax.random.normal(k1, (2, 8, 32), dtype=jnp.float32)
    x_image = jax.random.normal(k2, (2, 4, 16, 16), dtype=jnp.float32)

    params = make_child_params(hidden=32)

    fwd = jax.jit(
        lambda p, xt, xi: record_double_forward(synthetic_child, p, xt, xi))
    text_out, image_out = fwd(params, x_text, x_image)
    jax.block_until_ready((text_out, image_out))

    # Correctness: Identity must pass the child outputs through unchanged.
    ref_text, ref_image = jax.jit(synthetic_child)(params, x_text, x_image)
    assert text_out.shape == ref_text.shape and text_out.dtype == ref_text.dtype
    assert image_out.shape == ref_image.shape and image_out.dtype == ref_image.dtype
    assert bool(jnp.allclose(text_out, ref_text, rtol=1e-6, atol=1e-6))
    assert bool(jnp.allclose(image_out, ref_image, rtol=1e-6, atol=1e-6))

    print("KERNEL_OK")
</pallas_src>

<mosaic_0001>
module attributes {stable_mosaic.version = 11 : i64} {
  func.func @kernel(%arg0: i32, %arg1: memref<4x128xf32, #tpu.memory_space<vmem>>, %arg2: memref<16x128xf32, #tpu.memory_space<vmem>>, %arg3: memref<4x128xf32, #tpu.memory_space<vmem>>, %arg4: memref<16x128xf32, #tpu.memory_space<vmem>>) attributes {dimension_semantics = [#tpu.dimension_semantics<arbitrary>], iteration_bounds = array<i64: 1>, scalar_prefetch = 0 : i64, scratch_operands = 0 : i64, tpu.core_type = #tpu.core_type<tc>, window_params = [{pipeline_mode = #tpu.pipeline_mode<synchronous>, transform_indices = @transform_0, window_bounds = array<i64: 4, 128>}, {pipeline_mode = #tpu.pipeline_mode<synchronous>, transform_indices = @transform_1, window_bounds = array<i64: 16, 128>}, {pipeline_mode = #tpu.pipeline_mode<synchronous>, transform_indices = @transform_2, window_bounds = array<i64: 4, 128>}, {pipeline_mode = #tpu.pipeline_mode<synchronous>, transform_indices = @transform_3, window_bounds = array<i64: 16, 128>}]} {
    %c0 = arith.constant 0 : index
    %c0_0 = arith.constant 0 : index
    %0 = vector.load %arg1[%c0, %c0_0] : memref<4x128xf32, #tpu.memory_space<vmem>>, vector<4x128xf32>
    %c0_1 = arith.constant 0 : index
    %c0_2 = arith.constant 0 : index
    %1 = vector.load %arg3[%c0_1, %c0_2] : memref<4x128xf32, #tpu.memory_space<vmem>>, vector<4x128xf32>
    tpu.vector_store %arg3[%c0_1, %c0_2], %0 {strides = array<i32>} : memref<4x128xf32, #tpu.memory_space<vmem>>, vector<4x128xf32>,
    %c0_3 = arith.constant 0 : index
    %c0_4 = arith.constant 0 : index
    %2 = vector.load %arg2[%c0_3, %c0_4] : memref<16x128xf32, #tpu.memory_space<vmem>>, vector<16x128xf32>
    %c0_5 = arith.constant 0 : index
    %c0_6 = arith.constant 0 : index
    %3 = vector.load %arg4[%c0_5, %c0_6] : memref<16x128xf32, #tpu.memory_space<vmem>>, vector<16x128xf32>
    tpu.vector_store %arg4[%c0_5, %c0_6], %2 {strides = array<i32>} : memref<16x128xf32, #tpu.memory_space<vmem>>, vector<16x128xf32>,
    return
  }
  func.func @transform_0(%arg0: i32) -> (i32, i32) {
    %c0_i32 = arith.constant 0 : i32
    %c0_i32_0 = arith.constant 0 : i32
    %c0_i32_1 = arith.constant 0 : i32
    return %c0_i32, %c0_i32_0 : i32, i32
  }
  func.func @transform_1(%arg0: i32) -> (i32, i32) {
    %c0_i32 = arith.constant 0 : i32
    %c0_i32_0 = arith.constant 0 : i32
    %c0_i32_1 = arith.constant 0 : i32
    return %c0_i32, %c0_i32_0 : i32, i32
  }
  func.func @transform_2(%arg0: i32) -> (i32, i32) {
    %c0_i32 = arith.constant 0 : i32
    %c0_i32_0 = arith.constant 0 : i32
    %c0_i32_1 = arith.constant 0 : i32
    return %c0_i32, %c0_i32_0 : i32, i32
  }
  func.func @transform_3(%arg0: i32) -> (i32, i32) {
    %c0_i32 = arith.constant 0 : i32
    %c0_i32_0 = arith.constant 0 : i32
    %c0_i32_1 = arith.constant 0 : i32
    return %c0_i32, %c0_i32_0 : i32, i32
  }
}

</mosaic_0001>

<bundles_post_ra>
// kernel: _lambda_.1
= control target key start
LH: loop header
LB: loop body
LE: loop exit
PB: predicated region body
PF: predicated region fallthrough
CT: control target
= control target key end

     0   :  { %s65_s0 = inlined_call_operand.vmem [shape: f32[4,128], index: 0, kind: input, shape index: {}, may-alias: {0,2}]   ;;  %s66_s2 = inlined_call_operand.vmem [shape: f32[4,128], index: 2, kind: output, shape index: {0}, may-alias: {0,2}]   ;;  %s67_s1 = inlined_call_operand.vmem [shape: f32[16,128], index: 1, kind: input, shape index: {}, may-alias: {1,3}]   ;;  %s68_s3 = inlined_call_operand.vmem [shape: f32[16,128], index: 3, kind: output, shape index: {1}, may-alias: {1,3}]  }
   0x1   :  { %v13_v0 = vld [vmem:[%s65_s0] sm:$0xf]  ;;  %v16_v2 = vld [vmem:[%s67_s1 + $0x8] sm:$0xff] }
   0x2   :  { %v15_v1 = vld [vmem:[%s67_s1] sm:$0xff]  ;;  %14 = vst [vmem:[%s66_s2] sm:$0xf] %v13_v0 }
   0x3   :  { %17 = vst [vmem:[%s68_s3] sm:$0xff] %v15_v1  ;;  %18 = vst [vmem:[%s68_s3 + $0x8] sm:$0xff] %v16_v2 }

</bundles_post_ra>
